<compile_context>
chip_gen: v5e
topology: v5e:2x2
jax: 0.10.0
libtpu: 0.0.40
codegen_flags: <defaults>
</compile_context>

<pallas_src>
import jax
import jax.numpy as jnp
from jax.experimental import pallas as pl
from jax.experimental.pallas import tpu as pltpu

HIDDEN = 64   # matches `hidden_layer = 64` in the PyTorch module
LANE = 128    # TPU lane width


def _round_up(n, m):
    return ((n + m - 1) // m) * m


def qnetwork_kernel(x_ref, w1_ref, b1_ref, w2_ref, b2_ref, w3_ref, b3_ref, o_ref):
    # One (TB, state_size) batch tile per grid step; all weights/biases VMEM-resident.
    x = x_ref[...]                                                          # f32 [TB, S]
    h1 = jnp.dot(x, w1_ref[...], preferred_element_type=jnp.float32) + b1_ref[...]
    h1 = jnp.maximum(h1, 0.0)                                               # F.relu(fc1(x))
    h2 = jnp.dot(h1, w2_ref[...], preferred_element_type=jnp.float32) + b2_ref[...]
    h2 = jnp.maximum(h2, 0.0)                                               # F.relu(fc2(x))
    out = jnp.dot(h2, w3_ref[...], preferred_element_type=jnp.float32) + b3_ref[...]
    o_ref[...] = out.astype(o_ref.dtype)                                    # fc3(x), no activation


def prepare_params(params):
    """Pad the hidden dim to a lane multiple ONCE (outside the per-step forward).

    Zero padding is a mathematical no-op: padded rows/cols of W and padded bias
    entries are 0, and ReLU(0) = 0. State and action dims are left unpadded.
    Weights are stored [in, out]; biases as [1, out]. Everything stays float32.
    """
    hidden = params["w1"].shape[1]
    Hp = _round_up(hidden, LANE)
    ph = Hp - hidden
    f32 = jnp.float32
    return {
        "w1": jnp.pad(params["w1"].astype(f32), ((0, 0), (0, ph))),   # (S,  Hp)
        "b1": jnp.pad(params["b1"].astype(f32), ((0, 0), (0, ph))),   # (1,  Hp)
        "w2": jnp.pad(params["w2"].astype(f32), ((0, ph), (0, ph))),  # (Hp, Hp)
        "b2": jnp.pad(params["b2"].astype(f32), ((0, 0), (0, ph))),   # (1,  Hp)
        "w3": jnp.pad(params["w3"].astype(f32), ((0, ph), (0, 0))),   # (Hp, A)
        "b3": params["b3"].astype(f32),                               # (1,  A)
    }


def qnetwork_forward(x, padded_params, *, tb=1024, vmem_limit_bytes=32 * 1024 * 1024):
    """x: [B, state_size] float32. padded_params: output of prepare_params()."""
    p = padded_params
    B, state_size = x.shape
    assert p["w1"].shape[0] == state_size, "state_size mismatch with prepared params"
    action_size = p["w3"].shape[1]

    # Batch tile: multiple of 8 sublanes; capped at ceil(B/2) so there are >= 2 grid
    # steps whenever possible (lets v7x's 2 TensorCores both work), and at `tb`.
    TB = min(tb, max(8, _round_up(-(-B // 2), 8)))
    Bp = _round_up(B, TB)

    x_p = x.astype(jnp.float32)
    if Bp != B:
        x_p = jnp.pad(x_p, ((0, Bp - B), (0, 0)))   # batch-dim padding only

    # Constant block index => weights/biases stay VMEM-resident across the grid.
    def const_spec(a):
        return pl.BlockSpec(a.shape, lambda i: (0, 0))

    out = pl.pallas_call(
        qnetwork_kernel,
        out_shape=jax.ShapeDtypeStruct((Bp, action_size), jnp.float32),
        grid=(Bp // TB,),
        in_specs=[
            pl.BlockSpec((TB, state_size), lambda i: (i, 0)),   # x: batch-tiled, unpadded features
            const_spec(p["w1"]), const_spec(p["b1"]),
            const_spec(p["w2"]), const_spec(p["b2"]),
            const_spec(p["w3"]), const_spec(p["b3"]),
        ],
        out_specs=pl.BlockSpec((TB, action_size), lambda i: (i, 0)),  # unpadded action dim
        compiler_params=pltpu.CompilerParams(
            dimension_semantics=("parallel",),      # batch axis shards across v7x's 2 TCs
            vmem_limit_bytes=vmem_limit_bytes,      # 32 MiB: fits TB=1024-2048, v7x-safe
        ),
    )(x_p, p["w1"], p["b1"], p["w2"], p["b2"], p["w3"], p["b3"])

    return out[:B] if Bp != B else out


def init_params(key, state_size, action_size):
    """torch.nn.Linear-style init (U[-1/sqrt(fan_in), +1/sqrt(fan_in)]); weights stored [in, out]."""
    def linear(k, fan_in, fan_out):
        kw, kb = jax.random.split(k)
        bound = 1.0 / jnp.sqrt(fan_in)
        w = jax.random.uniform(kw, (fan_in, fan_out), jnp.float32, -bound, bound)
        b = jax.random.uniform(kb, (1, fan_out), jnp.float32, -bound, bound)
        return w, b

    k1, k2, k3 = jax.random.split(key, 3)
    w1, b1 = linear(k1, state_size, HIDDEN)
    w2, b2 = linear(k2, HIDDEN, HIDDEN)
    w3, b3 = linear(k3, HIDDEN, action_size)
    return {"w1": w1, "b1": b1, "w2": w2, "b2": b2, "w3": w3, "b3": b3}


def qnetwork_reference(x, p):
    """Pure-JAX f32 reference with the original module's semantics."""
    h1 = jnp.maximum(x @ p["w1"] + p["b1"], 0.0)
    h2 = jnp.maximum(h1 @ p["w2"] + p["b2"], 0.0)
    return h2 @ p["w3"] + p["b3"]


if __name__ == "__main__":
    key = jax.random.PRNGKey(0)
    state_size, action_size, batch = 8, 2, 8  # small shapes consistent with the FlappyBird DQN

    kx, kp, kx2 = jax.random.split(key, 3)
    params = init_params(kp, state_size, action_size)
    padded = prepare_params(params)            # hoisted out of the per-step forward (done once)

    # Case 1: tiny serving-style batch (single grid step).
    x = jax.random.normal(kx, (batch, state_size), jnp.float32)
    out = jax.block_until_ready(qnetwork_forward(x, padded))
    assert out.shape == (batch, action_size)
    assert jnp.allclose(out, qnetwork_reference(x, params), atol=1e-2, rtol=1e-2), \
        "mismatch vs f32 reference (small batch)"

    # Case 2: larger, non-tile-aligned batch exercising the multi-step pipelined grid.
    x2 = jax.random.normal(kx2, (300, state_size), jnp.float32)
    out2 = jax.block_until_ready(qnetwork_forward(x2, padded, tb=128))
    assert out2.shape == (300, action_size)
    assert jnp.allclose(out2, qnetwork_reference(x2, params), atol=1e-2, rtol=1e-2), \
        "mismatch vs f32 reference (tiled batch)"

    print("KERNEL_OK")
</pallas_src>

<mosaic_0001>
module attributes {stable_mosaic.version = 11 : i64} {
  func.func @qnetwork_kernel(%arg0: i32, %arg1: memref<8x8xf32, #tpu.memory_space<vmem>>, %arg2: memref<8x128xf32, #tpu.memory_space<vmem>>, %arg3: memref<1x128xf32, #tpu.memory_space<vmem>>, %arg4: memref<128x128xf32, #tpu.memory_space<vmem>>, %arg5: memref<1x128xf32, #tpu.memory_space<vmem>>, %arg6: memref<128x2xf32, #tpu.memory_space<vmem>>, %arg7: memref<1x2xf32, #tpu.memory_space<vmem>>, %arg8: memref<8x2xf32, #tpu.memory_space<vmem>>) attributes {dimension_semantics = [#tpu.dimension_semantics<parallel>], iteration_bounds = array<i64: 1>, scalar_prefetch = 0 : i64, scratch_operands = 0 : i64, tpu.core_type = #tpu.core_type<tc>, window_params = [{transform_indices = @transform_0, window_bounds = array<i64: 8, 8>}, {pipeline_mode = #tpu.pipeline_mode<synchronous>, transform_indices = @transform_1, window_bounds = array<i64: 8, 128>}, {pipeline_mode = #tpu.pipeline_mode<synchronous>, transform_indices = @transform_2, window_bounds = array<i64: 1, 128>}, {pipeline_mode = #tpu.pipeline_mode<synchronous>, transform_indices = @transform_3, window_bounds = array<i64: 128, 128>}, {pipeline_mode = #tpu.pipeline_mode<synchronous>, transform_indices = @transform_4, window_bounds = array<i64: 1, 128>}, {pipeline_mode = #tpu.pipeline_mode<synchronous>, transform_indices = @transform_5, window_bounds = array<i64: 128, 2>}, {pipeline_mode = #tpu.pipeline_mode<synchronous>, transform_indices = @transform_6, window_bounds = array<i64: 1, 2>}, {transform_indices = @transform_7, window_bounds = array<i64: 8, 2>}]} {
    %c0 = arith.constant 0 : index
    %c0_0 = arith.constant 0 : index
    %0 = vector.load %arg1[%c0, %c0_0] : memref<8x8xf32, #tpu.memory_space<vmem>>, vector<8x8xf32>
    %c0_1 = arith.constant 0 : index
    %c0_2 = arith.constant 0 : index
    %1 = vector.load %arg2[%c0_1, %c0_2] : memref<8x128xf32, #tpu.memory_space<vmem>>, vector<8x128xf32>
    %cst = arith.constant dense<0.000000e+00> : vector<8x128xf32>
    %2 = tpu.matmul %0, %1, %cst {dimension_numbers = #tpu.dot_dimension_numbers<[1], [0], [0], [1], [0, 0, 1, 1], [], []>} : vector<8x8xf32>, vector<8x128xf32>, vector<8x128xf32> -> vector<8x128xf32>
    %c0_3 = arith.constant 0 : index
    %c0_4 = arith.constant 0 : index
    %3 = vector.load %arg3[%c0_3, %c0_4] : memref<1x128xf32, #tpu.memory_space<vmem>>, vector<1x128xf32>
    %4 = vector.broadcast %3 : vector<1x128xf32> to vector<8x128xf32>
    %5 = arith.addf %2, %4 : vector<8x128xf32>
    %cst_5 = arith.constant 0.000000e+00 : f32
    %6 = vector.broadcast %cst_5 : f32 to vector<8x128xf32>
    %7 = arith.maximumf %5, %6 : vector<8x128xf32>
    %c0_6 = arith.constant 0 : index
    %c0_7 = arith.constant 0 : index
    %8 = vector.load %arg4[%c0_6, %c0_7] : memref<128x128xf32, #tpu.memory_space<vmem>>, vector<128x128xf32>
    %cst_8 = arith.constant dense<0.000000e+00> : vector<8x128xf32>
    %9 = tpu.matmul %7, %8, %cst_8 {dimension_numbers = #tpu.dot_dimension_numbers<[1], [0], [0], [1], [0, 0, 1, 1], [], []>} : vector<8x128xf32>, vector<128x128xf32>, vector<8x128xf32> -> vector<8x128xf32>
    %c0_9 = arith.constant 0 : index
    %c0_10 = arith.constant 0 : index
    %10 = vector.load %arg5[%c0_9, %c0_10] : memref<1x128xf32, #tpu.memory_space<vmem>>, vector<1x128xf32>
    %11 = vector.broadcast %10 : vector<1x128xf32> to vector<8x128xf32>
    %12 = arith.addf %9, %11 : vector<8x128xf32>
    %cst_11 = arith.constant 0.000000e+00 : f32
    %13 = vector.broadcast %cst_11 : f32 to vector<8x128xf32>
    %14 = arith.maximumf %12, %13 : vector<8x128xf32>
    %c0_12 = arith.constant 0 : index
    %c0_13 = arith.constant 0 : index
    %15 = vector.load %arg6[%c0_12, %c0_13] : memref<128x2xf32, #tpu.memory_space<vmem>>, vector<128x2xf32>
    %cst_14 = arith.constant dense<0.000000e+00> : vector<8x2xf32>
    %16 = tpu.matmul %14, %15, %cst_14 {dimension_numbers = #tpu.dot_dimension_numbers<[1], [0], [0], [1], [0, 0, 1, 1], [], []>} : vector<8x128xf32>, vector<128x2xf32>, vector<8x2xf32> -> vector<8x2xf32>
    %c0_15 = arith.constant 0 : index
    %c0_16 = arith.constant 0 : index
    %17 = vector.load %arg7[%c0_15, %c0_16] : memref<1x2xf32, #tpu.memory_space<vmem>>, vector<1x2xf32>
    %18 = vector.broadcast %17 : vector<1x2xf32> to vector<8x2xf32>
    %19 = arith.addf %16, %18 : vector<8x2xf32>
    %c0_17 = arith.constant 0 : index
    %c0_18 = arith.constant 0 : index
    %20 = vector.load %arg8[%c0_17, %c0_18] : memref<8x2xf32, #tpu.memory_space<vmem>>, vector<8x2xf32>
    tpu.vector_store %arg8[%c0_17, %c0_18], %19 {strides = array<i32>} : memref<8x2xf32, #tpu.memory_space<vmem>>, vector<8x2xf32>,
    return
  }
  func.func @transform_0(%arg0: i32) -> (i32, i32) {
    %c0_i32 = arith.constant 0 : i32
    %c0_i32_0 = arith.constant 0 : i32
    return %arg0, %c0_i32 : i32, i32
  }
  func.func @transform_1(%arg0: i32) -> (i32, i32) {
    %c0_i32 = arith.constant 0 : i32
    %c0_i32_0 = arith.constant 0 : i32
    %c0_i32_1 = arith.constant 0 : i32
    return %c0_i32, %c0_i32_0 : i32, i32
  }
  func.func @transform_2(%arg0: i32) -> (i32, i32) {
    %c0_i32 = arith.constant 0 : i32
    %c0_i32_0 = arith.constant 0 : i32
    %c0_i32_1 = arith.constant 0 : i32
    return %c0_i32, %c0_i32_0 : i32, i32
  }
  func.func @transform_3(%arg0: i32) -> (i32, i32) {
    %c0_i32 = arith.constant 0 : i32
    %c0_i32_0 = arith.constant 0 : i32
    %c0_i32_1 = arith.constant 0 : i32
    return %c0_i32, %c0_i32_0 : i32, i32
  }
  func.func @transform_4(%arg0: i32) -> (i32, i32) {
    %c0_i32 = arith.constant 0 : i32
    %c0_i32_0 = arith.constant 0 : i32
    %c0_i32_1 = arith.constant 0 : i32
    return %c0_i32, %c0_i32_0 : i32, i32
  }
  func.func @transform_5(%arg0: i32) -> (i32, i32) {
    %c0_i32 = arith.constant 0 : i32
    %c0_i32_0 = arith.constant 0 : i32
    %c0_i32_1 = arith.constant 0 : i32
    return %c0_i32, %c0_i32_0 : i32, i32
  }
  func.func @transform_6(%arg0: i32) -> (i32, i32) {
    %c0_i32 = arith.constant 0 : i32
    %c0_i32_0 = arith.constant 0 : i32
    %c0_i32_1 = arith.constant 0 : i32
    return %c0_i32, %c0_i32_0 : i32, i32
  }
  func.func @transform_7(%arg0: i32) -> (i32, i32) {
    %c0_i32 = arith.constant 0 : i32
    %c0_i32_0 = arith.constant 0 : i32
    return %arg0, %c0_i32 : i32, i32
  }
}

</mosaic_0001>

<bundles_post_ra>
// kernel: tpu_custom_call.1
= control target key start
LH: loop header
LB: loop body
LE: loop exit
PB: predicated region body
PF: predicated region fallthrough
CT: control target
= control target key end

     0   :  { %12 = vsyncpa [#allocation3], 0  ;;  %s388_s0 = inlined_call_operand.hbm [shape: f32[8,8], index: 0, kind: input, shape index: {}]   ;;  %s389_s1 = inlined_call_operand.hbm [shape: f32[8,128], index: 1, kind: input, shape index: {}]   ;;  %s390_s2 = inlined_call_operand.vmem [shape: f32[1,128], index: 2, kind: input, shape index: {}]   ;;  %s391_s3 = inlined_call_operand.vmem [shape: f32[128,128], index: 3, kind: input, shape index: {}]   ;;  %s392_s4 = inlined_call_operand.vmem [shape: f32[1,128], index: 4, kind: input, shape index: {}]   ;;  %s393_s5 = inlined_call_operand.vmem [shape: f32[128,2], index: 5, kind: input, shape index: {}]   ;;  %s394_s6 = inlined_call_operand.vmem [shape: f32[1,2], index: 6, kind: input, shape index: {}]   ;;  %s395_s7 = inlined_call_operand.vmem [shape: f32[8,2], index: 7, kind: output, shape index: {}]  }
   0x1   :  { %s19_s26 = sshll.u32 %s388_s0, 4  ;;  %s20_s26 = int_to_ptr.hbm [resolvable:$true] %s19_s26 }
   0x2   :  { %13 = vsyncpa [#allocation5], 0  ;;  %s232_s27 = smov [#allocation2]   ;;  %s30_s8 = sshll.u32 %s389_s1, 4  ;;  %s31_s8 = int_to_ptr.hbm [resolvable:$true] %s30_s8 }
   0x3   :  { %s21_s28 = sshll.u32 %s232_s27, 4  ;;  %s233_s9 = smov [#allocation4]   ;;  %s22_s28 = int_to_ptr.vmem [resolvable:$true] %s21_s28 }
   0x4   :  { %24 = dma.hbm_to_vmem [thread:$0]  %s20_s26, 128, %s22_s28, [#allocation3]  }
   0x5   :  { %s32_s10 = sshll.u32 %s233_s9, 4  ;;  %s33_s10 = int_to_ptr.vmem [resolvable:$true] %s32_s10 }
   0x6   :  { %35 = dma.hbm_to_vmem [thread:$0]  %s31_s8, 128, %s33_s10, [#allocation5]  }
   0x7   :  { %228 = dma.done.wait [#allocation3], 128  }
   0x8   :  { %229 = vsyncadd [#allocation3], 4294967168 }
   0x9   :  { %230 = dma.done.wait [#allocation5], 128  }
   0xa   :  { %231 = vsyncadd [#allocation5], 4294967168  ;;  %vm60_vm0 = vcmask 64512   ;;  %v55_v0 = vld [vmem:[#allocation4] sm:$0xff]  ;;  %v54_v1 = vld [vmem:[#allocation2] sm:$0xff]  ;;  %vm166_vm1 = vcmask 15360  }
   0xb   :  { %v100_v2 = vld [vmem:[%s391_s3 + $0x78] sm:$0xff]  ;;  %79 = vmatpush.msra.mxu0 %v55_v0  ;;  %v99_v3 = vld [vmem:[%s391_s3 + $0x70] sm:$0xff]  ;;  %v98_v4 = vld [vmem:[%s391_s3 + $0x68] sm:$0xff] }
   0xc   :  { %105 = vmatpush.msra.mxu1 %v100_v2  ;;  %174 = vmatmul.msk.f32.vlgmr.msra.gmra.mxu0 %vm60_vm0, %v54_v1  ;;  %v97_v5 = vld [vmem:[%s391_s3 + $0x60] sm:$0xff]  ;;  %v96_v6 = vld [vmem:[%s391_s3 + $0x58] sm:$0xff]  ;;  %v95_v7 = vld [vmem:[%s391_s3 + $0x50] sm:$0xff] }
   0xd   :  { %v94_v8 = vld [vmem:[%s391_s3 + $0x48] sm:$0xff]  ;;  %v93_v9 = vld [vmem:[%s391_s3 + $0x40] sm:$0xff]  ;;  %v92_v10 = vld [vmem:[%s391_s3 + $0x38] sm:$0xff] }
   0xe   :  { %106 = vmatpush.msra.mxu1 %v99_v3  ;;  %v91_v11 = vld [vmem:[%s391_s3 + $0x30] sm:$0xff]  ;;  %v90_v12 = vld [vmem:[%s391_s3 + $0x28] sm:$0xff]  ;;  %v89_v13 = vld [vmem:[%s391_s3 + $0x20] sm:$0xff] }
   0xf   :  { %v88_v14 = vld [vmem:[%s391_s3 + $0x18] sm:$0xff]  ;;  %v87_v15 = vld [vmem:[%s391_s3 + $0x10] sm:$0xff]  ;;  %v86_v16 = vld [vmem:[%s391_s3 + $0x8] sm:$0xff] }
  0x10   :  { %107 = vmatpush.msra.mxu1 %v98_v4  ;;  %v85_v17 = vld [vmem:[%s391_s3] sm:$0xff]  ;;  %v141_v18 = vld [vmem:[%s393_s5 + $0x78] sm:$0xff]  ;;  %v140_v19 = vld [vmem:[%s393_s5 + $0x70] sm:$0xff] }
  0x11   :  { %146 = vmatpush.msra.mxu2 %v141_v18  ;;  %v139_v20 = vld [vmem:[%s393_s5 + $0x68] sm:$0xff]  ;;  %v138_v21 = vld [vmem:[%s393_s5 + $0x60] sm:$0xff]  ;;  %v137_v22 = vld [vmem:[%s393_s5 + $0x58] sm:$0xff] }
  0x12   :  { %108 = vmatpush.msra.mxu1 %v97_v5  ;;  %v136_v23 = vld [vmem:[%s393_s5 + $0x50] sm:$0xff]  ;;  %v135_v24 = vld [vmem:[%s393_s5 + $0x48] sm:$0xff]  ;;  %v134_v25 = vld [vmem:[%s393_s5 + $0x40] sm:$0xff] }
  0x13   :  { %147 = vmatpush.msra.mxu2 %v140_v19  ;;  %v133_v26 = vld [vmem:[%s393_s5 + $0x38] sm:$0xff]  ;;  %v132_v27 = vld [vmem:[%s393_s5 + $0x30] sm:$0xff]  ;;  %v131_v28 = vld [vmem:[%s393_s5 + $0x28] sm:$0xff] }
  0x14   :  { %109 = vmatpush.msra.mxu1 %v96_v6  ;;  %v130_v29 = vld [vmem:[%s393_s5 + $0x20] sm:$0xff]  ;;  %v129_v30 = vld [vmem:[%s393_s5 + $0x18] sm:$0xff]  ;;  %v128_v35 = vld [vmem:[%s393_s5 + $0x10] sm:$0xff] }
  0x15   :  { %148 = vmatpush.msra.mxu2 %v139_v20  ;;  %v177_v31 = vld [vmem:[%s390_s2] ss:$0 sm:$0xff]  ;;  %v127_v36 = vld [vmem:[%s393_s5 + $0x8] sm:$0xff] }
  0x16   :  { %110 = vmatpush.msra.mxu1 %v95_v7  ;;  %v126_v37 = vld [vmem:[%s393_s5] sm:$0xff] }
  0x17   :  { %149 = vmatpush.msra.mxu2 %v138_v21  ;;  %v178_v38 = vld [vmem:[%s392_s4] ss:$0 sm:$0xff] }
  0x18   :  { %111 = vmatpush.msra.mxu1 %v94_v8  ;;  %v179_v42 = vld [vmem:[%s394_s6] ss:$0 sm:$0xff] }
  0x19   :  { %150 = vmatpush.msra.mxu2 %v137_v22 }
  0x1a   :  { %112 = vmatpush.msra.mxu1 %v93_v9 }
  0x1b   :  { %151 = vmatpush.msra.mxu2 %v136_v23 }
  0x1c   :  { %113 = vmatpush.msra.mxu1 %v92_v10 }
  0x1d   :  { %152 = vmatpush.msra.mxu2 %v135_v24 }
  0x1e   :  { %114 = vmatpush.msra.mxu1 %v91_v11 }
  0x1f   :  { %153 = vmatpush.msra.mxu2 %v134_v25 }
  0x20   :  { %115 = vmatpush.msra.mxu1 %v90_v12 }
  0x21   :  { %154 = vmatpush.msra.mxu2 %v133_v26 }
  0x22   :  { %116 = vmatpush.msra.mxu1 %v89_v13 }
  0x23   :  { %155 = vmatpush.msra.mxu2 %v132_v27 }
  0x24   :  { %117 = vmatpush.msra.mxu1 %v88_v14 }
  0x25   :  { %156 = vmatpush.msra.mxu2 %v131_v28 }
  0x26   :  { %118 = vmatpush.msra.mxu1 %v87_v15 }
  0x27   :  { %157 = vmatpush.msra.mxu2 %v130_v29 }
  0x28   :  { %119 = vmatpush.msra.mxu1 %v86_v16 }
  0x29   :  { %158 = vmatpush.msra.mxu2 %v129_v30 }
  0x2a   :  { %120 = vmatpush.msra.mxu1 %v85_v17 }
  0x2b   :  { %159 = vmatpush.msra.mxu2 %v128_v35 }
  0x2d   :  { %160 = vmatpush.msra.mxu2 %v127_v36 }
  0x2f   :  { %161 = vmatpush.msra.mxu2 %v126_v37 }
  0x89   :  { %v81_v32 = vpop.f32.mrf.mxu0 }
  0x8a   :  { %v82_v33 = vadd.f32 %v177_v31, %v81_v32 }
  0x8c   :  { %v84_v34 = vmax.f32 %v82_v33, 0.0 }
  0x8e   :  { %121 = vmatmul.f32.vlgmr.msra.gmra.mxu1 %v84_v34 }
 0x10b   :  { %v122_v39 = vpop.f32.mrf.mxu1 }
 0x10c   :  { %v123_v40 = vadd.f32 %v178_v38, %v122_v39 }
 0x10e   :  { %v125_v41 = vmax.f32 %v123_v40, 0.0 }
 0x110   :  { %162 = vmatmul.f32.vlgmr.msra.gmra.mxu2 %v125_v41 }
 0x193   :  { %v163_v43 = vpop.f32.mrf.mxu2 }
 0x194   :  { %v164_v44 = vadd.f32 %v179_v42, %v163_v43 }
 0x196   :  { %167 = vst.msk [vmem:[%s395_s7] sm:$0xff] %vm166_vm1, %v164_v44 }
 0x197   :  { %172 = vsyncpa [#allocation3], 1 }
 0x198   :  { %173 = vsyncpa [#allocation5], 1 }

</bundles_post_ra>
